<compile_context>
chip_gen: v6e
topology: v6e:2x2x1
jax: 0.10.0
libtpu: 0.0.40
codegen_flags: <defaults>
</compile_context>

<pallas_src>
import math
import functools

import jax
import jax.numpy as jnp
from jax.experimental import pallas as pl
from jax.experimental.pallas import tpu as pltpu


# ----------------------------- helpers -------------------------------------

def _pick_tile(n, candidates):
    """Largest candidate tile that evenly divides n, else n (full extent)."""
    for c in candidates:
        if n >= c and n % c == 0:
            return c
    return n


# ----------------------------- Pallas kernels ------------------------------

def _attn_block_kernel(xq_ref, xkv_ref, bias_ref, wq_ref, bq_ref, wkv_ref,
                       bkv_ref, wo_ref, bo_ref, g_ref, beta_ref, o_ref,
                       *, n_heads, scale, eps):
    """Fused: QKV proj + multi-head attention + out proj + residual + LayerNorm.

    One grid step == one batch element; all heads are handled here (no per-head
    kernel launches and the mask bias is read once per batch element).
    """
    xq = xq_ref[0]        # [Lq, D]  f32
    xkv = xkv_ref[0]      # [Lk, D]  f32
    bias = bias_ref[0]    # [Lq, Lk] f32 additive mask bias

    D = wq_ref.shape[0]
    dh = D // n_heads

    xq_b = xq.astype(jnp.bfloat16)
    xkv_b = xkv.astype(jnp.bfloat16)

    # Fused projections (bf16 MXU inputs, f32 accumulation).
    q = jnp.dot(xq_b, wq_ref[...].astype(jnp.bfloat16),
                preferred_element_type=jnp.float32) + bq_ref[...]
    q = q * scale                                       # fold 1/sqrt(dh) into q
    kv = jnp.dot(xkv_b, wkv_ref[...].astype(jnp.bfloat16),
                 preferred_element_type=jnp.float32) + bkv_ref[...]
    k = kv[:, :D]
    v = kv[:, D:]

    # Per-head attention (static unrolled loop; everything stays in VMEM/vregs).
    ctxs = []
    for h in range(n_heads):
        sl = slice(h * dh, (h + 1) * dh)
        qh = q[:, sl].astype(jnp.bfloat16)              # [Lq, dh]
        kh = k[:, sl].astype(jnp.bfloat16)              # [Lk, dh]
        vh = v[:, sl].astype(jnp.bfloat16)              # [Lk, dh]
        s = jax.lax.dot_general(qh, kh, (((1,), (1,)), ((), ())),
                                preferred_element_type=jnp.float32)
        s = s + bias                                    # f32 mask add
        m = jnp.max(s, axis=-1, keepdims=True)
        p = jnp.exp(s - m)
        denom = jnp.sum(p, axis=-1, keepdims=True)
        p = p * pl.reciprocal(denom, approx=True)       # EUP reciprocal
        ctxs.append(jnp.dot(p.astype(jnp.bfloat16), vh,
                            preferred_element_type=jnp.float32))
    ctx = jnp.concatenate(ctxs, axis=-1)                # [Lq, D] lane-dense

    # Output projection + residual + LayerNorm (f32 stats, eps=1e-5 like torch).
    o = jnp.dot(ctx.astype(jnp.bfloat16), wo_ref[...].astype(jnp.bfloat16),
                preferred_element_type=jnp.float32) + bo_ref[...]
    z = xq + o
    mu = jnp.mean(z, axis=-1, keepdims=True)
    var = jnp.mean((z - mu) ** 2, axis=-1, keepdims=True)
    o_ref[0] = (z - mu) * jax.lax.rsqrt(var + eps) * g_ref[...] + beta_ref[...]


def _ffn_block_kernel(x_ref, w1_ref, b1_ref, w2_ref, b2_ref, g_ref, beta_ref,
                      o_ref, *, eps):
    """Fused: Linear -> ReLU -> Linear -> residual add -> LayerNorm."""
    x = x_ref[...]                                      # [tm, D] f32
    h = jnp.dot(x.astype(jnp.bfloat16), w1_ref[...].astype(jnp.bfloat16),
                preferred_element_type=jnp.float32) + b1_ref[...]
    h = jnp.maximum(h, 0.0)                             # ReLU in f32
    y = jnp.dot(h.astype(jnp.bfloat16), w2_ref[...].astype(jnp.bfloat16),
                preferred_element_type=jnp.float32) + b2_ref[...]
    z = x + y
    mu = jnp.mean(z, axis=-1, keepdims=True)
    var = jnp.mean((z - mu) ** 2, axis=-1, keepdims=True)
    o_ref[...] = (z - mu) * jax.lax.rsqrt(var + eps) * g_ref[...] + beta_ref[...]


def _linear_kernel(x_ref, w_ref, b_ref, o_ref):
    o_ref[...] = (
        jnp.dot(x_ref[...].astype(jnp.bfloat16), w_ref[...].astype(jnp.bfloat16),
                preferred_element_type=jnp.float32)
        + b_ref[...]
    )


# ----------------------------- kernel wrappers ------------------------------

def attention_block(x_q, x_kv, bias, ap, ln_g, ln_b, n_heads, eps=1e-5):
    """LayerNorm(x_q + MHA(x_q, x_kv, x_kv, bias)); one pallas_call, grid over B."""
    B, Lq, D = x_q.shape
    Lk = x_kv.shape[1]
    scale = 1.0 / math.sqrt(D // n_heads)
    kernel = functools.partial(_attn_block_kernel, n_heads=n_heads,
                               scale=scale, eps=eps)
    return pl.pallas_call(
        kernel,
        grid=(B,),
        in_specs=[
            pl.BlockSpec((1, Lq, D), lambda b: (b, 0, 0)),      # x_q
            pl.BlockSpec((1, Lk, D), lambda b: (b, 0, 0)),      # x_kv
            pl.BlockSpec((1, Lq, Lk), lambda b: (b, 0, 0)),     # mask bias (once per batch)
            pl.BlockSpec((D, D), lambda b: (0, 0)),             # wq
            pl.BlockSpec((1, D), lambda b: (0, 0)),             # bq
            pl.BlockSpec((D, 2 * D), lambda b: (0, 0)),         # wkv (fused)
            pl.BlockSpec((1, 2 * D), lambda b: (0, 0)),         # bkv
            pl.BlockSpec((D, D), lambda b: (0, 0)),             # wo
            pl.BlockSpec((1, D), lambda b: (0, 0)),             # bo
            pl.BlockSpec((1, D), lambda b: (0, 0)),             # ln gamma
            pl.BlockSpec((1, D), lambda b: (0, 0)),             # ln beta
        ],
        out_specs=pl.BlockSpec((1, Lq, D), lambda b: (b, 0, 0)),
        out_shape=jax.ShapeDtypeStruct((B, Lq, D), jnp.float32),
        compiler_params=pltpu.CompilerParams(dimension_semantics=("parallel",)),
    )(x_q, x_kv, bias,
      ap["wq"], ap["bq"].reshape(1, D),
      ap["wkv"], ap["bkv"].reshape(1, 2 * D),
      ap["wo"], ap["bo"].reshape(1, D),
      ln_g.reshape(1, D), ln_b.reshape(1, D))


def ffn_block(x, w1, b1, w2, b2, ln_g, ln_b, eps=1e-5):
    """LayerNorm(x + FFN(x)); row-tiled over flattened B*L."""
    B, L, D = x.shape
    M = B * L
    DFF = w1.shape[1]
    tm = _pick_tile(M, (512, 256, 128))
    x2 = x.reshape(M, D)
    out = pl.pallas_call(
        functools.partial(_ffn_block_kernel, eps=eps),
        grid=(M // tm,),
        in_specs=[
            pl.BlockSpec((tm, D), lambda i: (i, 0)),
            pl.BlockSpec((D, DFF), lambda i: (0, 0)),
            pl.BlockSpec((1, DFF), lambda i: (0, 0)),
            pl.BlockSpec((DFF, D), lambda i: (0, 0)),
            pl.BlockSpec((1, D), lambda i: (0, 0)),
            pl.BlockSpec((1, D), lambda i: (0, 0)),
            pl.BlockSpec((1, D), lambda i: (0, 0)),
        ],
        out_specs=pl.BlockSpec((tm, D), lambda i: (i, 0)),
        out_shape=jax.ShapeDtypeStruct((M, D), jnp.float32),
        compiler_params=pltpu.CompilerParams(dimension_semantics=("parallel",)),
    )(x2, w1, b1.reshape(1, DFF), w2, b2.reshape(1, D),
      ln_g.reshape(1, D), ln_b.reshape(1, D))
    return out.reshape(B, L, D)


def linear(x2d, w, b):
    """Tiled x2d @ w + b with parallel (M, N) grid.  N tiles <= 1024 lanes so
    large vocab projections stream through VMEM (v7x 64 MiB budget).
    K (= d_model) is kept untiled; add a K grid axis + VMEM accumulator if
    d_model ever outgrows a single VMEM tile."""
    M, K = x2d.shape
    N = w.shape[1]
    tm = _pick_tile(M, (512, 256, 128))
    tn = _pick_tile(N, (1024, 512, 256, 128))
    return pl.pallas_call(
        _linear_kernel,
        grid=(M // tm, N // tn),
        in_specs=[
            pl.BlockSpec((tm, K), lambda i, j: (i, 0)),
            pl.BlockSpec((K, tn), lambda i, j: (0, j)),
            pl.BlockSpec((1, tn), lambda i, j: (0, j)),
        ],
        out_specs=pl.BlockSpec((tm, tn), lambda i, j: (i, j)),
        out_shape=jax.ShapeDtypeStruct((M, N), jnp.float32),
        compiler_params=pltpu.CompilerParams(
            dimension_semantics=("parallel", "parallel")),
    )(x2d, w, b.reshape(1, N))


# ----------------------------- model (glue in JAX) -------------------------

def encoder_layer(x, p, mask_bias, n_heads):
    x = attention_block(x, x, mask_bias, p["self_attn"], p["ln1_g"], p["ln1_b"], n_heads)
    x = ffn_block(x, p["ff_w1"], p["ff_b1"], p["ff_w2"], p["ff_b2"],
                  p["ln2_g"], p["ln2_b"])
    return x


def decoder_layer(x, enc_out, p, tgt_bias, src_bias, n_heads):
    x = attention_block(x, x, tgt_bias, p["self_attn"], p["ln1_g"], p["ln1_b"], n_heads)
    x = attention_block(x, enc_out, src_bias, p["cross_attn"], p["ln2_g"], p["ln2_b"], n_heads)
    x = ffn_block(x, p["ff_w1"], p["ff_b1"], p["ff_w2"], p["ff_b2"],
                  p["ln3_g"], p["ln3_b"])
    return x


def sinusoidal_pe(max_len, d_model):
    pos = jnp.arange(max_len, dtype=jnp.float32)[:, None]
    div = jnp.exp(jnp.arange(0, d_model, 2, dtype=jnp.float32)
                  * (-math.log(10000.0) / d_model))
    pe = jnp.zeros((max_len, d_model), jnp.float32)
    pe = pe.at[:, 0::2].set(jnp.sin(pos * div))
    pe = pe.at[:, 1::2].set(jnp.cos(pos * div))
    return pe


def embed(tokens, table, pe, d_model):
    # padding_idx=0 handled at init (row 0 zeroed). Gather + PE add left to XLA.
    x = jnp.take(table, tokens, axis=0) * math.sqrt(d_model)
    return x + pe[None, : tokens.shape[1], :]


def mask_to_bias(mask, B, Lq, Lk):
    """mask: optional bool [B, Lq, Lk] (True = masked) -> additive float bias."""
    if mask is None:
        return jnp.zeros((B, Lq, Lk), jnp.float32)
    return jnp.where(mask, -1e9, 0.0).astype(jnp.float32)


def transformer_forward(params, src, tgt, src_mask=None, tgt_mask=None):
    cfg = params["cfg"]
    D, H = cfg["d_model"], cfg["n_heads"]
    B, Ls = src.shape
    Lt = tgt.shape[1]

    src_self_bias = mask_to_bias(src_mask, B, Ls, Ls)
    tgt_self_bias = mask_to_bias(tgt_mask, B, Lt, Lt)
    cross_bias = jnp.zeros((B, Lt, Ls), jnp.float32)  # src_mask for cross-attn (None here)

    # encoder
    x = embed(src, params["src_emb"], params["pe"], D)
    for lp in params["enc_layers"]:
        x = encoder_layer(x, lp, src_self_bias, H)
    enc_out = x

    # decoder
    y = embed(tgt, params["tgt_emb"], params["pe"], D)
    for lp in params["dec_layers"]:
        y = decoder_layer(y, enc_out, lp, tgt_self_bias, cross_bias, H)

    # output projection to vocab logits
    logits = linear(y.reshape(B * Lt, D), params["out_w"], params["out_b"])
    return logits.reshape(B, Lt, cfg["tgt_vocab"])


# ----------------------------- parameter init ------------------------------

def make_params(key, src_vocab, tgt_vocab, d_model, n_heads, num_layers,
                dim_feedforward, max_pos):
    keys = iter(jax.random.split(key, 4096))

    def dense(fan_in, fan_out):
        w = 0.02 * jax.random.normal(next(keys), (fan_in, fan_out), jnp.float32)
        b = jnp.zeros((fan_out,), jnp.float32)
        return w, b

    def mha_params():
        wq, bq = dense(d_model, d_model)
        wkv, bkv = dense(d_model, 2 * d_model)   # fused K|V projection
        wo, bo = dense(d_model, d_model)
        return dict(wq=wq, bq=bq, wkv=wkv, bkv=bkv, wo=wo, bo=bo)

    def enc_layer_params():
        w1, b1 = dense(d_model, dim_feedforward)
        w2, b2 = dense(dim_feedforward, d_model)
        return dict(self_attn=mha_params(),
                    ff_w1=w1, ff_b1=b1, ff_w2=w2, ff_b2=b2,
                    ln1_g=jnp.ones((d_model,), jnp.float32),
                    ln1_b=jnp.zeros((d_model,), jnp.float32),
                    ln2_g=jnp.ones((d_model,), jnp.float32),
                    ln2_b=jnp.zeros((d_model,), jnp.float32))

    def dec_layer_params():
        w1, b1 = dense(d_model, dim_feedforward)
        w2, b2 = dense(dim_feedforward, d_model)
        return dict(self_attn=mha_params(), cross_attn=mha_params(),
                    ff_w1=w1, ff_b1=b1, ff_w2=w2, ff_b2=b2,
                    ln1_g=jnp.ones((d_model,), jnp.float32),
                    ln1_b=jnp.zeros((d_model,), jnp.float32),
                    ln2_g=jnp.ones((d_model,), jnp.float32),
                    ln2_b=jnp.zeros((d_model,), jnp.float32),
                    ln3_g=jnp.ones((d_model,), jnp.float32),
                    ln3_b=jnp.zeros((d_model,), jnp.float32))

    src_emb = 0.02 * jax.random.normal(next(keys), (src_vocab, d_model), jnp.float32)
    src_emb = src_emb.at[0].set(0.0)   # padding_idx=0
    tgt_emb = 0.02 * jax.random.normal(next(keys), (tgt_vocab, d_model), jnp.float32)
    tgt_emb = tgt_emb.at[0].set(0.0)   # padding_idx=0
    out_w, out_b = dense(d_model, tgt_vocab)

    return dict(
        cfg=dict(d_model=d_model, n_heads=n_heads, tgt_vocab=tgt_vocab),
        src_emb=src_emb, tgt_emb=tgt_emb, pe=sinusoidal_pe(max_pos, d_model),
        enc_layers=[enc_layer_params() for _ in range(num_layers)],
        dec_layers=[dec_layer_params() for _ in range(num_layers)],
        out_w=out_w, out_b=out_b,
    )


def causal_mask(B, L):
    # True above the diagonal == masked (matches generate_square_subsequent_mask)
    m = jnp.triu(jnp.ones((L, L), bool), k=1)
    return jnp.broadcast_to(m, (B, L, L))


# ----------------------------- main -----------------------------------------

if __name__ == "__main__":
    B = 2
    SRC_LEN, TGT_LEN = 8, 8
    SRC_VOCAB, TGT_VOCAB = 32, 40
    D_MODEL, N_HEADS, NUM_LAYERS, DFF = 32, 4, 2, 64
    MAX_POS = 64

    root = jax.random.PRNGKey(0)
    kp, ks, kt = jax.random.split(root, 3)

    params = make_params(kp, SRC_VOCAB, TGT_VOCAB, D_MODEL, N_HEADS,
                         NUM_LAYERS, DFF, MAX_POS)

    src = jax.random.randint(ks, (B, SRC_LEN), 1, SRC_VOCAB, dtype=jnp.int32)
    tgt = jax.random.randint(kt, (B, TGT_LEN), 1, TGT_VOCAB, dtype=jnp.int32)
    tgt_mask = causal_mask(B, TGT_LEN)   # decoder causal self-attention mask

    fwd = jax.jit(lambda s, t, m: transformer_forward(params, s, t,
                                                      src_mask=None, tgt_mask=m))
    logits = fwd(src, tgt, tgt_mask)
    jax.block_until_ready(logits)

    assert logits.shape == (B, TGT_LEN, TGT_VOCAB), logits.shape
    assert jnp.all(jnp.isfinite(logits))
    print("KERNEL_OK")
</pallas_src>

<mosaic_0001>
module attributes {stable_mosaic.version = 11 : i64} {
  func.func @_ffn_block_kernel(%arg0: i32, %arg1: memref<16x32xf32, #tpu.memory_space<vmem>>, %arg2: memref<32x64xf32, #tpu.memory_space<vmem>>, %arg3: memref<1x64xf32, #tpu.memory_space<vmem>>, %arg4: memref<64x32xf32, #tpu.memory_space<vmem>>, %arg5: memref<1x32xf32, #tpu.memory_space<vmem>>, %arg6: memref<1x32xf32, #tpu.memory_space<vmem>>, %arg7: memref<1x32xf32, #tpu.memory_space<vmem>>, %arg8: memref<16x32xf32, #tpu.memory_space<vmem>>) attributes {dimension_semantics = [#tpu.dimension_semantics<parallel>], iteration_bounds = array<i64: 1>, scalar_prefetch = 0 : i64, scratch_operands = 0 : i64, tpu.core_type = #tpu.core_type<tc>, window_params = [{transform_indices = @transform_0, window_bounds = array<i64: 16, 32>}, {pipeline_mode = #tpu.pipeline_mode<synchronous>, transform_indices = @transform_1, window_bounds = array<i64: 32, 64>}, {pipeline_mode = #tpu.pipeline_mode<synchronous>, transform_indices = @transform_2, window_bounds = array<i64: 1, 64>}, {pipeline_mode = #tpu.pipeline_mode<synchronous>, transform_indices = @transform_3, window_bounds = array<i64: 64, 32>}, {pipeline_mode = #tpu.pipeline_mode<synchronous>, transform_indices = @transform_4, window_bounds = array<i64: 1, 32>}, {pipeline_mode = #tpu.pipeline_mode<synchronous>, transform_indices = @transform_5, window_bounds = array<i64: 1, 32>}, {pipeline_mode = #tpu.pipeline_mode<synchronous>, transform_indices = @transform_6, window_bounds = array<i64: 1, 32>}, {transform_indices = @transform_7, window_bounds = array<i64: 16, 32>}]} {
    %c0 = arith.constant 0 : index
    %c0_0 = arith.constant 0 : index
    %0 = vector.load %arg1[%c0, %c0_0] : memref<16x32xf32, #tpu.memory_space<vmem>>, vector<16x32xf32>
    %1 = arith.truncf %0 : vector<16x32xf32> to vector<16x32xbf16>
    %c0_1 = arith.constant 0 : index
    %c0_2 = arith.constant 0 : index
    %2 = vector.load %arg2[%c0_1, %c0_2] : memref<32x64xf32, #tpu.memory_space<vmem>>, vector<32x64xf32>
    %3 = arith.truncf %2 : vector<32x64xf32> to vector<32x64xbf16>
    %cst = arith.constant dense<0.000000e+00> : vector<16x64xf32>
    %4 = tpu.matmul %1, %3, %cst {dimension_numbers = #tpu.dot_dimension_numbers<[1], [0], [0], [1], [0, 0, 1, 1], [], []>} : vector<16x32xbf16>, vector<32x64xbf16>, vector<16x64xf32> -> vector<16x64xf32>
    %c0_3 = arith.constant 0 : index
    %c0_4 = arith.constant 0 : index
    %5 = vector.load %arg3[%c0_3, %c0_4] : memref<1x64xf32, #tpu.memory_space<vmem>>, vector<1x64xf32>
    %6 = vector.broadcast %5 : vector<1x64xf32> to vector<16x64xf32>
    %7 = arith.addf %4, %6 : vector<16x64xf32>
    %cst_5 = arith.constant 0.000000e+00 : f32
    %8 = vector.broadcast %cst_5 : f32 to vector<16x64xf32>
    %9 = arith.maximumf %7, %8 : vector<16x64xf32>
    %10 = arith.truncf %9 : vector<16x64xf32> to vector<16x64xbf16>
    %c0_6 = arith.constant 0 : index
    %c0_7 = arith.constant 0 : index
    %11 = vector.load %arg4[%c0_6, %c0_7] : memref<64x32xf32, #tpu.memory_space<vmem>>, vector<64x32xf32>
    %12 = arith.truncf %11 : vector<64x32xf32> to vector<64x32xbf16>
    %cst_8 = arith.constant dense<0.000000e+00> : vector<16x32xf32>
    %13 = tpu.matmul %10, %12, %cst_8 {dimension_numbers = #tpu.dot_dimension_numbers<[1], [0], [0], [1], [0, 0, 1, 1], [], []>} : vector<16x64xbf16>, vector<64x32xbf16>, vector<16x32xf32> -> vector<16x32xf32>
    %c0_9 = arith.constant 0 : index
    %c0_10 = arith.constant 0 : index
    %14 = vector.load %arg5[%c0_9, %c0_10] : memref<1x32xf32, #tpu.memory_space<vmem>>, vector<1x32xf32>
    %15 = vector.broadcast %14 : vector<1x32xf32> to vector<16x32xf32>
    %16 = arith.addf %13, %15 : vector<16x32xf32>
    %17 = arith.addf %0, %16 : vector<16x32xf32>
    %cst_11 = arith.constant dense<0.000000e+00> : vector<16xf32>
    %18 = vector.multi_reduction <add>, %17, %cst_11 [1] : vector<16x32xf32> to vector<16xf32>
    %19 = vector.shape_cast %18 : vector<16xf32> to vector<16x1xf32>
    %cst_12 = arith.constant 3.200000e+01 : f32
    %20 = vector.broadcast %cst_12 : f32 to vector<16x1xf32>
    %21 = arith.divf %19, %20 : vector<16x1xf32>
    %22 = vector.broadcast %21 : vector<16x1xf32> to vector<16x32xf32>
    %23 = arith.subf %17, %22 : vector<16x32xf32>
    %24 = arith.mulf %23, %23 : vector<16x32xf32>
    %cst_13 = arith.constant dense<0.000000e+00> : vector<16xf32>
    %25 = vector.multi_reduction <add>, %24, %cst_13 [1] : vector<16x32xf32> to vector<16xf32>
    %26 = vector.shape_cast %25 : vector<16xf32> to vector<16x1xf32>
    %cst_14 = arith.constant 3.200000e+01 : f32
    %27 = vector.broadcast %cst_14 : f32 to vector<16x1xf32>
    %28 = arith.divf %26, %27 : vector<16x1xf32>
    %29 = vector.broadcast %21 : vector<16x1xf32> to vector<16x32xf32>
    %30 = arith.subf %17, %29 : vector<16x32xf32>
    %cst_15 = arith.constant 9.99999974E-6 : f32
    %31 = vector.broadcast %cst_15 : f32 to vector<16x1xf32>
    %32 = arith.addf %28, %31 : vector<16x1xf32>
    %33 = math.rsqrt %32 : vector<16x1xf32>
    %34 = vector.broadcast %33 : vector<16x1xf32> to vector<16x32xf32>
    %35 = arith.mulf %30, %34 : vector<16x32xf32>
    %c0_16 = arith.constant 0 : index
    %c0_17 = arith.constant 0 : index
    %36 = vector.load %arg6[%c0_16, %c0_17] : memref<1x32xf32, #tpu.memory_space<vmem>>, vector<1x32xf32>
    %37 = vector.broadcast %36 : vector<1x32xf32> to vector<16x32xf32>
    %38 = arith.mulf %35, %37 : vector<16x32xf32>
    %c0_18 = arith.constant 0 : index
    %c0_19 = arith.constant 0 : index
    %39 = vector.load %arg7[%c0_18, %c0_19] : memref<1x32xf32, #tpu.memory_space<vmem>>, vector<1x32xf32>
    %40 = vector.broadcast %39 : vector<1x32xf32> to vector<16x32xf32>
    %41 = arith.addf %38, %40 : vector<16x32xf32>
    %c0_20 = arith.constant 0 : index
    %c0_21 = arith.constant 0 : index
    %42 = vector.load %arg8[%c0_20, %c0_21] : memref<16x32xf32, #tpu.memory_space<vmem>>, vector<16x32xf32>
    tpu.vector_store %arg8[%c0_20, %c0_21], %41 {strides = array<i32>} : memref<16x32xf32, #tpu.memory_space<vmem>>, vector<16x32xf32>,
    return
  }
  func.func @transform_0(%arg0: i32) -> (i32, i32) {
    %c0_i32 = arith.constant 0 : i32
    %c0_i32_0 = arith.constant 0 : i32
    return %arg0, %c0_i32 : i32, i32
  }
  func.func @transform_1(%arg0: i32) -> (i32, i32) {
    %c0_i32 = arith.constant 0 : i32
    %c0_i32_0 = arith.constant 0 : i32
    %c0_i32_1 = arith.constant 0 : i32
    return %c0_i32, %c0_i32_0 : i32, i32
  }
  func.func @transform_2(%arg0: i32) -> (i32, i32) {
    %c0_i32 = arith.constant 0 : i32
    %c0_i32_0 = arith.constant 0 : i32
    %c0_i32_1 = arith.constant 0 : i32
    return %c0_i32, %c0_i32_0 : i32, i32
  }
  func.func @transform_3(%arg0: i32) -> (i32, i32) {
    %c0_i32 = arith.constant 0 : i32
    %c0_i32_0 = arith.constant 0 : i32
    %c0_i32_1 = arith.constant 0 : i32
    return %c0_i32, %c0_i32_0 : i32, i32
  }
  func.func @transform_4(%arg0: i32) -> (i32, i32) {
    %c0_i32 = arith.constant 0 : i32
    %c0_i32_0 = arith.constant 0 : i32
    %c0_i32_1 = arith.constant 0 : i32
    return %c0_i32, %c0_i32_0 : i32, i32
  }
  func.func @transform_5(%arg0: i32) -> (i32, i32) {
    %c0_i32 = arith.constant 0 : i32
    %c0_i32_0 = arith.constant 0 : i32
    %c0_i32_1 = arith.constant 0 : i32
    return %c0_i32, %c0_i32_0 : i32, i32
  }
  func.func @transform_6(%arg0: i32) -> (i32, i32) {
    %c0_i32 = arith.constant 0 : i32
    %c0_i32_0 = arith.constant 0 : i32
    %c0_i32_1 = arith.constant 0 : i32
    return %c0_i32, %c0_i32_0 : i32, i32
  }
  func.func @transform_7(%arg0: i32) -> (i32, i32) {
    %c0_i32 = arith.constant 0 : i32
    %c0_i32_0 = arith.constant 0 : i32
    return %arg0, %c0_i32 : i32, i32
  }
}

module attributes {stable_mosaic.version = 11 : i64} {
  func.func @_linear_kernel(%arg0: i32, %arg1: i32, %arg2: memref<16x32xf32, #tpu.memory_space<vmem>>, %arg3: memref<32x40xf32, #tpu.memory_space<vmem>>, %arg4: memref<1x40xf32, #tpu.memory_space<vmem>>, %arg5: memref<16x40xf32, #tpu.memory_space<vmem>>) attributes {dimension_semantics = [#tpu.dimension_semantics<parallel>, #tpu.dimension_semantics<parallel>], iteration_bounds = array<i64: 1, 1>, scalar_prefetch = 0 : i64, scratch_operands = 0 : i64, tpu.core_type = #tpu.core_type<tc>, window_params = [{transform_indices = @transform_0, window_bounds = array<i64: 16, 32>}, {transform_indices = @transform_1, window_bounds = array<i64: 32, 40>}, {transform_indices = @transform_2, window_bounds = array<i64: 1, 40>}, {transform_indices = @transform_3, window_bounds = array<i64: 16, 40>}]} {
    %c0 = arith.constant 0 : index
    %c0_0 = arith.constant 0 : index
    %0 = vector.load %arg2[%c0, %c0_0] : memref<16x32xf32, #tpu.memory_space<vmem>>, vector<16x32xf32>
    %1 = arith.truncf %0 : vector<16x32xf32> to vector<16x32xbf16>
    %c0_1 = arith.constant 0 : index
    %c0_2 = arith.constant 0 : index
    %2 = vector.load %arg3[%c0_1, %c0_2] : memref<32x40xf32, #tpu.memory_space<vmem>>, vector<32x40xf32>
    %3 = arith.truncf %2 : vector<32x40xf32> to vector<32x40xbf16>
    %cst = arith.constant dense<0.000000e+00> : vector<16x40xf32>
    %4 = tpu.matmul %1, %3, %cst {dimension_numbers = #tpu.dot_dimension_numbers<[1], [0], [0], [1], [0, 0, 1, 1], [], []>} : vector<16x32xbf16>, vector<32x40xbf16>, vector<16x40xf32> -> vector<16x40xf32>
    %c0_3 = arith.constant 0 : index
    %c0_4 = arith.constant 0 : index
    %5 = vector.load %arg4[%c0_3, %c0_4] : memref<1x40xf32, #tpu.memory_space<vmem>>, vector<1x40xf32>
    %6 = vector.broadcast %5 : vector<1x40xf32> to vector<16x40xf32>
    %7 = arith.addf %4, %6 : vector<16x40xf32>
    %c0_5 = arith.constant 0 : index
    %c0_6 = arith.constant 0 : index
    %8 = vector.load %arg5[%c0_5, %c0_6] : memref<16x40xf32, #tpu.memory_space<vmem>>, vector<16x40xf32>
    tpu.vector_store %arg5[%c0_5, %c0_6], %7 {strides = array<i32>} : memref<16x40xf32, #tpu.memory_space<vmem>>, vector<16x40xf32>,
    return
  }
  func.func @transform_0(%arg0: i32, %arg1: i32) -> (i32, i32) {
    %c0_i32 = arith.constant 0 : i32
    %c0_i32_0 = arith.constant 0 : i32
    return %arg0, %c0_i32 : i32, i32
  }
  func.func @transform_1(%arg0: i32, %arg1: i32) -> (i32, i32) {
    %c0_i32 = arith.constant 0 : i32
    %c0_i32_0 = arith.constant 0 : i32
    return %c0_i32, %arg1 : i32, i32
  }
  func.func @transform_2(%arg0: i32, %arg1: i32) -> (i32, i32) {
    %c0_i32 = arith.constant 0 : i32
    %c0_i32_0 = arith.constant 0 : i32
    return %c0_i32, %arg1 : i32, i32
  }
  func.func @transform_3(%arg0: i32, %arg1: i32) -> (i32, i32) {
    %c0_i32 = arith.constant 0 : i32
    return %arg0, %arg1 : i32, i32
  }
}

module attributes {stable_mosaic.version = 11 : i64} {
  func.func @_attn_block_kernel(%arg0: i32, %arg1: memref<1x8x32xf32, #tpu.memory_space<vmem>>, %arg2: memref<1x8x32xf32, #tpu.memory_space<vmem>>, %arg3: memref<1x8x8xf32, #tpu.memory_space<vmem>>, %arg4: memref<32x32xf32, #tpu.memory_space<vmem>>, %arg5: memref<1x32xf32, #tpu.memory_space<vmem>>, %arg6: memref<32x64xf32, #tpu.memory_space<vmem>>, %arg7: memref<1x64xf32, #tpu.memory_space<vmem>>, %arg8: memref<32x32xf32, #tpu.memory_space<vmem>>, %arg9: memref<1x32xf32, #tpu.memory_space<vmem>>, %arg10: memref<1x32xf32, #tpu.memory_space<vmem>>, %arg11: memref<1x32xf32, #tpu.memory_space<vmem>>, %arg12: memref<1x8x32xf32, #tpu.memory_space<vmem>>) attributes {dimension_semantics = [#tpu.dimension_semantics<parallel>], iteration_bounds = array<i64: 2>, scalar_prefetch = 0 : i64, scratch_operands = 0 : i64, tpu.core_type = #tpu.core_type<tc>, window_params = [{transform_indices = @transform_0, window_bounds = array<i64: 1, 8, 32>}, {transform_indices = @transform_1, window_bounds = array<i64: 1, 8, 32>}, {transform_indices = @transform_2, window_bounds = array<i64: 1, 8, 8>}, {pipeline_mode = #tpu.pipeline_mode<synchronous>, transform_indices = @transform_3, window_bounds = array<i64: 32, 32>}, {pipeline_mode = #tpu.pipeline_mode<synchronous>, transform_indices = @transform_4, window_bounds = array<i64: 1, 32>}, {pipeline_mode = #tpu.pipeline_mode<synchronous>, transform_indices = @transform_5, window_bounds = array<i64: 32, 64>}, {pipeline_mode = #tpu.pipeline_mode<synchronous>, transform_indices = @transform_6, window_bounds = array<i64: 1, 64>}, {pipeline_mode = #tpu.pipeline_mode<synchronous>, transform_indices = @transform_7, window_bounds = array<i64: 32, 32>}, {pipeline_mode = #tpu.pipeline_mode<synchronous>, transform_indices = @transform_8, window_bounds = array<i64: 1, 32>}, {pipeline_mode = #tpu.pipeline_mode<synchronous>, transform_indices = @transform_9, window_bounds = array<i64: 1, 32>}, {pipeline_mode = #tpu.pipeline_mode<synchronous>, transform_indices = @transform_10, window_bounds = array<i64: 1, 32>}, {transform_indices = @transform_11, window_bounds = array<i64: 1, 8, 32>}]} {
    %c0 = arith.constant 0 : index
    %c0_0 = arith.constant 0 : index
    %c0_1 = arith.constant 0 : index
    %0 = vector.load %arg1[%c0, %c0_0, %c0_1] : memref<1x8x32xf32, #tpu.memory_space<vmem>>, vector<1x8x32xf32>
    %1 = vector.shape_cast %0 : vector<1x8x32xf32> to vector<8x32xf32>
    %c0_2 = arith.constant 0 : index
    %c0_3 = arith.constant 0 : index
    %c0_4 = arith.constant 0 : index
    %2 = vector.load %arg2[%c0_2, %c0_3, %c0_4] : memref<1x8x32xf32, #tpu.memory_space<vmem>>, vector<1x8x32xf32>
    %3 = vector.shape_cast %2 : vector<1x8x32xf32> to vector<8x32xf32>
    %c0_5 = arith.constant 0 : index
    %c0_6 = arith.constant 0 : index
    %c0_7 = arith.constant 0 : index
    %4 = vector.load %arg3[%c0_5, %c0_6, %c0_7] : memref<1x8x8xf32, #tpu.memory_space<vmem>>, vector<1x8x8xf32>
    %5 = vector.shape_cast %4 : vector<1x8x8xf32> to vector<8x8xf32>
    %6 = arith.truncf %1 : vector<8x32xf32> to vector<8x32xbf16>
    %7 = arith.truncf %3 : vector<8x32xf32> to vector<8x32xbf16>
    %c0_8 = arith.constant 0 : index
    %c0_9 = arith.constant 0 : index
    %8 = vector.load %arg4[%c0_8, %c0_9] : memref<32x32xf32, #tpu.memory_space<vmem>>, vector<32x32xf32>
    %9 = arith.truncf %8 : vector<32x32xf32> to vector<32x32xbf16>
    %cst = arith.constant dense<0.000000e+00> : vector<8x32xf32>
    %10 = tpu.matmul %6, %9, %cst {dimension_numbers = #tpu.dot_dimension_numbers<[1], [0], [0], [1], [0, 0, 1, 1], [], []>} : vector<8x32xbf16>, vector<32x32xbf16>, vector<8x32xf32> -> vector<8x32xf32>
    %c0_10 = arith.constant 0 : index
    %c0_11 = arith.constant 0 : index
    %11 = vector.load %arg5[%c0_10, %c0_11] : memref<1x32xf32, #tpu.memory_space<vmem>>, vector<1x32xf32>
    %12 = vector.broadcast %11 : vector<1x32xf32> to vector<8x32xf32>
    %13 = arith.addf %10, %12 : vector<8x32xf32>
    %cst_12 = arith.constant 0.353553385 : f32
    %14 = vector.broadcast %cst_12 : f32 to vector<8x32xf32>
    %15 = arith.mulf %13, %14 : vector<8x32xf32>
    %c0_13 = arith.constant 0 : index
    %c0_14 = arith.constant 0 : index
    %16 = vector.load %arg6[%c0_13, %c0_14] : memref<32x64xf32, #tpu.memory_space<vmem>>, vector<32x64xf32>
    %17 = arith.truncf %16 : vector<32x64xf32> to vector<32x64xbf16>
    %cst_15 = arith.constant dense<0.000000e+00> : vector<8x64xf32>
    %18 = tpu.matmul %7, %17, %cst_15 {dimension_numbers = #tpu.dot_dimension_numbers<[1], [0], [0], [1], [0, 0, 1, 1], [], []>} : vector<8x32xbf16>, vector<32x64xbf16>, vector<8x64xf32> -> vector<8x64xf32>
    %c0_16 = arith.constant 0 : index
    %c0_17 = arith.constant 0 : index
    %19 = vector.load %arg7[%c0_16, %c0_17] : memref<1x64xf32, #tpu.memory_space<vmem>>, vector<1x64xf32>
    %20 = vector.broadcast %19 : vector<1x64xf32> to vector<8x64xf32>
    %21 = arith.addf %18, %20 : vector<8x64xf32>
    %22 = vector.extract_strided_slice %21 {offsets = [0, 0], sizes = [8, 32], strides = [1, 1]} : vector<8x64xf32> to vector<8x32xf32>
    %23 = vector.extract_strided_slice %21 {offsets = [0, 32], sizes = [8, 32], strides = [1, 1]} : vector<8x64xf32> to vector<8x32xf32>
    %24 = vector.extract_strided_slice %15 {offsets = [0, 0], sizes = [8, 8], strides = [1, 1]} : vector<8x32xf32> to vector<8x8xf32>
    %25 = arith.truncf %24 : vector<8x8xf32> to vector<8x8xbf16>
    %26 = vector.extract_strided_slice %22 {offsets = [0, 0], sizes = [8, 8], strides = [1, 1]} : vector<8x32xf32> to vector<8x8xf32>
    %27 = arith.truncf %26 : vector<8x8xf32> to vector<8x8xbf16>
    %28 = vector.extract_strided_slice %23 {offsets = [0, 0], sizes = [8, 8], strides = [1, 1]} : vector<8x32xf32> to vector<8x8xf32>
    %29 = arith.truncf %28 : vector<8x8xf32> to vector<8x8xbf16>
    %cst_18 = arith.constant dense<0.000000e+00> : vector<8x8xf32>
    %30 = tpu.matmul %25, %27, %cst_18 {dimension_numbers = #tpu.dot_dimension_numbers<[1], [1], [0], [0], [0, 0, 1, 0], [], []>} : vector<8x8xbf16>, vector<8x8xbf16>, vector<8x8xf32> -> vector<8x8xf32>
    %31 = arith.addf %30, %5 : vector<8x8xf32>
    %cst_19 = arith.constant dense<0xFF800000> : vector<8xf32>
    %32 = vector.multi_reduction <maximumf>, %31, %cst_19 [1] : vector<8x8xf32> to vector<8xf32>
    %33 = vector.shape_cast %32 : vector<8xf32> to vector<8x1xf32>
    %34 = vector.broadcast %33 : vector<8x1xf32> to vector<8x8xf32>
    %35 = arith.subf %31, %34 : vector<8x8xf32>
    %36 = math.exp %35 : vector<8x8xf32>
    %cst_20 = arith.constant dense<0.000000e+00> : vector<8xf32>
    %37 = vector.multi_reduction <add>, %36, %cst_20 [1] : vector<8x8xf32> to vector<8xf32>
    %38 = vector.shape_cast %37 : vector<8xf32> to vector<8x1xf32>
    %39 = tpu.reciprocal %38 {approx = true} : vector<8x1xf32> -> vector<8x1xf32>
    %40 = vector.broadcast %39 : vector<8x1xf32> to vector<8x8xf32>
    %41 = arith.mulf %36, %40 : vector<8x8xf32>
    %42 = arith.truncf %41 : vector<8x8xf32> to vector<8x8xbf16>
    %cst_21 = arith.constant dense<0.000000e+00> : vector<8x8xf32>
    %43 = tpu.matmul %42, %29, %cst_21 {dimension_numbers = #tpu.dot_dimension_numbers<[1], [0], [0], [1], [0, 0, 1, 1], [], []>} : vector<8x8xbf16>, vector<8x8xbf16>, vector<8x8xf32> -> vector<8x8xf32>
    %44 = vector.extract_strided_slice %15 {offsets = [0, 8], sizes = [8, 8], strides = [1, 1]} : vector<8x32xf32> to vector<8x8xf32>
    %45 = arith.truncf %44 : vector<8x8xf32> to vector<8x8xbf16>
    %46 = vector.extract_strided_slice %22 {offsets = [0, 8], sizes = [8, 8], strides = [1, 1]} : vector<8x32xf32> to vector<8x8xf32>
    %47 = arith.truncf %46 : vector<8x8xf32> to vector<8x8xbf16>
    %48 = vector.extract_strided_slice %23 {offsets = [0, 8], sizes = [8, 8], strides = [1, 1]} : vector<8x32xf32> to vector<8x8xf32>
    %49 = arith.truncf %48 : vector<8x8xf32> to vector<8x8xbf16>
    %cst_22 = arith.constant dense<0.000000e+00> : vector<8x8xf32>
    %50 = tpu.matmul %45, %47, %cst_22 {dimension_numbers = #tpu.dot_dimension_numbers<[1], [1], [0], [0], [0, 0, 1, 0], [], []>} : vector<8x8xbf16>, vector<8x8xbf16>, vector<8x8xf32> -> vector<8x8xf32>
    %51 = arith.addf %50, %5 : vector<8x8xf32>
    %cst_23 = arith.constant dense<0xFF800000> : vector<8xf32>
    %52 = vector.multi_reduction <maximumf>, %51, %cst_23 [1] : vector<8x8xf32> to vector<8xf32>
    %53 = vector.shape_cast %52 : vector<8xf32> to vector<8x1xf32>
    %54 = vector.broadcast %53 : vector<8x1xf32> to vector<8x8xf32>
    %55 = arith.subf %51, %54 : vector<8x8xf32>
    %56 = math.exp %55 : vector<8x8xf32>
    %cst_24 = arith.constant dense<0.000000e+00> : vector<8xf32>
    %57 = vector.multi_reduction <add>, %56, %cst_24 [1] : vector<8x8xf32> to vector<8xf32>
    %58 = vector.shape_cast %57 : vector<8xf32> to vector<8x1xf32>
    %59 = tpu.reciprocal %58 {approx = true} : vector<8x1xf32> -> vector<8x1xf32>
    %60 = vector.broadcast %59 : vector<8x1xf32> to vector<8x8xf32>
    %61 = arith.mulf %56, %60 : vector<8x8xf32>
    %62 = arith.truncf %61 : vector<8x8xf32> to vector<8x8xbf16>
    %cst_25 = arith.constant dense<0.000000e+00> : vector<8x8xf32>
    %63 = tpu.matmul %62, %49, %cst_25 {dimension_numbers = #tpu.dot_dimension_numbers<[1], [0], [0], [1], [0, 0, 1, 1], [], []>} : vector<8x8xbf16>, vector<8x8xbf16>, vector<8x8xf32> -> vector<8x8xf32>
    %64 = vector.extract_strided_slice %15 {offsets = [0, 16], sizes = [8, 8], strides = [1, 1]} : vector<8x32xf32> to vector<8x8xf32>
    %65 = arith.truncf %64 : vector<8x8xf32> to vector<8x8xbf16>
    %66 = vector.extract_strided_slice %22 {offsets = [0, 16], sizes = [8, 8], strides = [1, 1]} : vector<8x32xf32> to vector<8x8xf32>
    %67 = arith.truncf %66 : vector<8x8xf32> to vector<8x8xbf16>
    %68 = vector.extract_strided_slice %23 {offsets = [0, 16], sizes = [8, 8], strides = [1, 1]} : vector<8x32xf32> to vector<8x8xf32>
    %69 = arith.truncf %68 : vector<8x8xf32> to vector<8x8xbf16>
    %cst_26 = arith.constant dense<0.000000e+00> : vector<8x8xf32>
    %70 = tpu.matmul %65, %67, %cst_26 {dimension_numbers = #tpu.dot_dimension_numbers<[1], [1], [0], [0], [0, 0, 1, 0], [], []>} : vector<8x8xbf16>, vector<8x8xbf16>, vector<8x8xf32> -> vector<8x8xf32>
    %71 = arith.addf %70, %5 : vector<8x8xf32>
    %cst_27 = arith.constant dense<0xFF800000> : vector<8xf32>
    %72 = vector.multi_reduction <maximumf>, %71, %cst_27 [1] : vector<8x8xf32> to vector<8xf32>
    %73 = vector.shape_cast %72 : vector<8xf32> to vector<8x1xf32>
    %74 = vector.broadcast %73 : vector<8x1xf32> to vector<8x8xf32>
    %75 = arith.subf %71, %74 : vector<8x8xf32>
    %76 = math.exp %75 : vector<8x8xf32>
    %cst_28 = arith.constant dense<0.000000e+00> : vector<8xf32>
    %77 = vector.multi_reduction <add>, %76, %cst_28 [1] : vector<8x8xf32> to vector<8xf32>
    %78 = vector.shape_cast %77 : vector<8xf32> to vector<8x1xf32>
    %79 = tpu.reciprocal %78 {approx = true} : vector<8x1xf32> -> vector<8x1xf32>
    %80 = vector.broadcast %79 : vector<8x1xf32> to vector<8x8xf32>
    %81 = arith.mulf %76, %80 : vector<8x8xf32>
    %82 = arith.truncf %81 : vector<8x8xf32> to vector<8x8xbf16>
    %cst_29 = arith.constant dense<0.000000e+00> : vector<8x8xf32>
    %83 = tpu.matmul %82, %69, %cst_29 {dimension_numbers = #tpu.dot_dimension_numbers<[1], [0], [0], [1], [0, 0, 1, 1], [], []>} : vector<8x8xbf16>, vector<8x8xbf16>, vector<8x8xf32> -> vector<8x8xf32>
    %84 = vector.extract_strided_slice %15 {offsets = [0, 24], sizes = [8, 8], strides = [1, 1]} : vector<8x32xf32> to vector<8x8xf32>
    %85 = arith.truncf %84 : vector<8x8xf32> to vector<8x8xbf16>
    %86 = vector.extract_strided_slice %22 {offsets = [0, 24], sizes = [8, 8], strides = [1, 1]} : vector<8x32xf32> to vector<8x8xf32>
    %87 = arith.truncf %86 : vector<8x8xf32> to vector<8x8xbf16>
    %88 = vector.extract_strided_slice %23 {offsets = [0, 24], sizes = [8, 8], strides = [1, 1]} : vector<8x32xf32> to vector<8x8xf32>
    %89 = arith.truncf %88 : vector<8x8xf32> to vector<8x8xbf16>
    %cst_30 = arith.constant dense<0.000000e+00> : vector<8x8xf32>
    %90 = tpu.matmul %85, %87, %cst_30 {dimension_numbers = #tpu.dot_dimension_numbers<[1], [1], [0], [0], [0, 0, 1, 0], [], []>} : vector<8x8xbf16>, vector<8x8xbf16>, vector<8x8xf32> -> vector<8x8xf32>
    %91 = arith.addf %90, %5 : vector<8x8xf32>
    %cst_31 = arith.constant dense<0xFF800000> : vector<8xf32>
    %92 = vector.multi_reduction <maximumf>, %91, %cst_31 [1] : vector<8x8xf32> to vector<8xf32>
    %93 = vector.shape_cast %92 : vector<8xf32> to vector<8x1xf32>
    %94 = vector.broadcast %93 : vector<8x1xf32> to vector<8x8xf32>
    %95 = arith.subf %91, %94 : vector<8x8xf32>
    %96 = math.exp %95 : vector<8x8xf32>
    %cst_32 = arith.constant dense<0.000000e+00> : vector<8xf32>
    %97 = vector.multi_reduction <add>, %96, %cst_32 [1] : vector<8x8xf32> to vector<8xf32>
    %98 = vector.shape_cast %97 : vector<8xf32> to vector<8x1xf32>
    %99 = tpu.reciprocal %98 {approx = true} : vector<8x1xf32> -> vector<8x1xf32>
    %100 = vector.broadcast %99 : vector<8x1xf32> to vector<8x8xf32>
    %101 = arith.mulf %96, %100 : vector<8x8xf32>
    %102 = arith.truncf %101 : vector<8x8xf32> to vector<8x8xbf16>
    %cst_33 = arith.constant dense<0.000000e+00> : vector<8x8xf32>
    %103 = tpu.matmul %102, %89, %cst_33 {dimension_numbers = #tpu.dot_dimension_numbers<[1], [0], [0], [1], [0, 0, 1, 1], [], []>} : vector<8x8xbf16>, vector<8x8xbf16>, vector<8x8xf32> -> vector<8x8xf32>
    %104 = tpu.concatenate %43, %63, %83, %103 in 1 : vector<8x8xf32>, vector<8x8xf32>, vector<8x8xf32>, vector<8x8xf32> -> vector<8x32xf32>
    %105 = arith.truncf %104 : vector<8x32xf32> to vector<8x32xbf16>
    %c0_34 = arith.constant 0 : index
    %c0_35 = arith.constant 0 : index
    %106 = vector.load %arg8[%c0_34, %c0_35] : memref<32x32xf32, #tpu.memory_space<vmem>>, vector<32x32xf32>
    %107 = arith.truncf %106 : vector<32x32xf32> to vector<32x32xbf16>
    %cst_36 = arith.constant dense<0.000000e+00> : vector<8x32xf32>
    %108 = tpu.matmul %105, %107, %cst_36 {dimension_numbers = #tpu.dot_dimension_numbers<[1], [0], [0], [1], [0, 0, 1, 1], [], []>} : vector<8x32xbf16>, vector<32x32xbf16>, vector<8x32xf32> -> vector<8x32xf32>
    %c0_37 = arith.constant 0 : index
    %c0_38 = arith.constant 0 : index
    %109 = vector.load %arg9[%c0_37, %c0_38] : memref<1x32xf32, #tpu.memory_space<vmem>>, vector<1x32xf32>
    %110 = vector.broadcast %109 : vector<1x32xf32> to vector<8x32xf32>
    %111 = arith.addf %108, %110 : vector<8x32xf32>
    %112 = arith.addf %1, %111 : vector<8x32xf32>
    %cst_39 = arith.constant dense<0.000000e+00> : vector<8xf32>
    %113 = vector.multi_reduction <add>, %112, %cst_39 [1] : vector<8x32xf32> to vector<8xf32>
    %114 = vector.shape_cast %113 : vector<8xf32> to vector<8x1xf32>
    %cst_40 = arith.constant 3.200000e+01 : f32
    %115 = vector.broadcast %cst_40 : f32 to vector<8x1xf32>
    %116 = arith.divf %114, %115 : vector<8x1xf32>
    %117 = vector.broadcast %116 : vector<8x1xf32> to vector<8x32xf32>
    %118 = arith.subf %112, %117 : vector<8x32xf32>
    %119 = arith.mulf %118, %118 : vector<8x32xf32>
    %cst_41 = arith.constant dense<0.000000e+00> : vector<8xf32>
    %120 = vector.multi_reduction <add>, %119, %cst_41 [1] : vector<8x32xf32> to vector<8xf32>
    %121 = vector.shape_cast %120 : vector<8xf32> to vector<8x1xf32>
    %cst_42 = arith.constant 3.200000e+01 : f32
    %122 = vector.broadcast %cst_42 : f32 to vector<8x1xf32>
    %123 = arith.divf %121, %122 : vector<8x1xf32>
    %124 = vector.broadcast %116 : vector<8x1xf32> to vector<8x32xf32>
    %125 = arith.subf %112, %124 : vector<8x32xf32>
    %cst_43 = arith.constant 9.99999974E-6 : f32
    %126 = vector.broadcast %cst_43 : f32 to vector<8x1xf32>
    %127 = arith.addf %123, %126 : vector<8x1xf32>
    %128 = math.rsqrt %127 : vector<8x1xf32>
    %129 = vector.broadcast %128 : vector<8x1xf32> to vector<8x32xf32>
    %130 = arith.mulf %125, %129 : vector<8x32xf32>
    %c0_44 = arith.constant 0 : index
    %c0_45 = arith.constant 0 : index
    %131 = vector.load %arg10[%c0_44, %c0_45] : memref<1x32xf32, #tpu.memory_space<vmem>>, vector<1x32xf32>
    %132 = vector.broadcast %131 : vector<1x32xf32> to vector<8x32xf32>
    %133 = arith.mulf %130, %132 : vector<8x32xf32>
    %c0_46 = arith.constant 0 : index
    %c0_47 = arith.constant 0 : index
    %134 = vector.load %arg11[%c0_46, %c0_47] : memref<1x32xf32, #tpu.memory_space<vmem>>, vector<1x32xf32>
    %135 = vector.broadcast %134 : vector<1x32xf32> to vector<8x32xf32>
    %136 = arith.addf %133, %135 : vector<8x32xf32>
    %c0_48 = arith.constant 0 : index
    %c0_49 = arith.constant 0 : index
    %c0_50 = arith.constant 0 : index
    %137 = vector.load %arg12[%c0_48, %c0_49, %c0_50] : memref<1x8x32xf32, #tpu.memory_space<vmem>>, vector<1x8x32xf32>
    %138 = vector.shape_cast %137 : vector<1x8x32xf32> to vector<8x32xf32>
    %139 = vector.shape_cast %136 : vector<8x32xf32> to vector<1x8x32xf32>
    tpu.vector_store %arg12[%c0_48, %c0_49, %c0_50], %139 {strides = array<i32>} : memref<1x8x32xf32, #tpu.memory_space<vmem>>, vector<1x8x32xf32>,
    return
  }
  func.func @transform_0(%arg0: i32) -> (i32, i32, i32) {
    %c0_i32 = arith.constant 0 : i32
    %c0_i32_0 = arith.constant 0 : i32
    %c0_i32_1 = arith.constant 0 : i32
    return %arg0, %c0_i32, %c0_i32_0 : i32, i32, i32
  }
  func.func @transform_1(%arg0: i32) -> (i32, i32, i32) {
    %c0_i32 = arith.constant 0 : i32
    %c0_i32_0 = arith.constant 0 : i32
    %c0_i32_1 = arith.constant 0 : i32
    return %arg0, %c0_i32, %c0_i32_0 : i32, i32, i32
  }
  func.func @transform_2(%arg0: i32) -> (i32, i32, i32) {
    %c0_i32 = arith.constant 0 : i32
    %c0_i32_0 = arith.constant 0 : i32
    %c0_i32_1 = arith.constant 0 : i32
    return %arg0, %c0_i32, %c0_i32_0 : i32, i32, i32
  }
  func.func @transform_3(%arg0: i32) -> (i32, i32) {
    %c0_i32 = arith.constant 0 : i32
    %c0_i32_0 = arith.constant 0 : i32
    %c0_i32_1 = arith.constant 0 : i32
    return %c0_i32, %c0_i32_0 : i32, i32
  }
  func.func @transform_4(%arg0: i32) -> (i32, i32) {
    %c0_i32 = arith.constant 0 : i32
    %c0_i32_0 = arith.constant 0 : i32
    %c0_i32_1 = arith.constant 0 : i32
    return %c0_i32, %c0_i32_0 : i32, i32
  }
  func.func @transform_5(%arg0: i32) -> (i32, i32) {
    %c0_i32 = arith.constant 0 : i32
    %c0_i32_0 = arith.constant 0 : i32
    %c0_i32_1 = arith.constant 0 : i32
    return %c0_i32, %c0_i32_0 : i32, i32
  }
  func.func @transform_6(%arg0: i32) -> (i32, i32) {
    %c0_i32 = arith.constant 0 : i32
    %c0_i32_0 = arith.constant 0 : i32
    %c0_i32_1 = arith.constant 0 : i32
    return %c0_i32, %c0_i32_0 : i32, i32
  }
  func.func @transform_7(%arg0: i32) -> (i32, i32) {
    %c0_i32 = arith.constant 0 : i32
    %c0_i32_0 = arith.constant 0 : i32
    %c0_i32_1 = arith.constant 0 : i32
    return %c0_i32, %c0_i32_0 : i32, i32
  }
  func.func @transform_8(%arg0: i32) -> (i32, i32) {
    %c0_i32 = arith.constant 0 : i32
    %c0_i32_0 = arith.constant 0 : i32
    %c0_i32_1 = arith.constant 0 : i32
    return %c0_i32, %c0_i32_0 : i32, i32
  }
  func.func @transform_9(%arg0: i32) -> (i32, i32) {
    %c0_i32 = arith.constant 0 : i32
    %c0_i32_0 = arith.constant 0 : i32
    %c0_i32_1 = arith.constant 0 : i32
    return %c0_i32, %c0_i32_0 : i32, i32
  }
  func.func @transform_10(%arg0: i32) -> (i32, i32) {
    %c0_i32 = arith.constant 0 : i32
    %c0_i32_0 = arith.constant 0 : i32
    %c0_i32_1 = arith.constant 0 : i32
    return %c0_i32, %c0_i32_0 : i32, i32
  }
  func.func @transform_11(%arg0: i32) -> (i32, i32, i32) {
    %c0_i32 = arith.constant 0 : i32
    %c0_i32_0 = arith.constant 0 : i32
    %c0_i32_1 = arith.constant 0 : i32
    return %arg0, %c0_i32, %c0_i32_0 : i32, i32, i32
  }
}

</mosaic_0001>

<bundles_post_ra>
// kernel: _lambda_.21
= control target key start
LH: loop header
LB: loop body
LE: loop exit
PB: predicated region body
PF: predicated region fallthrough
CT: control target
= control target key end

     0   :  { %v136_v3 = vmov 0.0   ;;  %vm137_vm0 = vmmov 0   ;;  %s185_s0 = inlined_call_operand.vmem [shape: f32[16,32], index: 0, kind: input, shape index: {}]   ;;  %s186_s1 = inlined_call_operand.vmem [shape: f32[32,40], index: 1, kind: input, shape index: {}]   ;;  %s187_s2 = inlined_call_operand.vmem [shape: f32[1,40], index: 2, kind: input, shape index: {}]   ;;  %s188_s3 = inlined_call_operand.hbm [shape: f32[16,40], index: 3, kind: output, shape index: {}]  }
   0x1   :  { %v21_v0 = vld [vmem:[%s186_s1 + $0x10] sm:$0xff]  ;;  %v22_v1 = vld [vmem:[%s186_s1 + $0x18] sm:$0xff]  ;;  %v19_v2 = vld [vmem:[%s186_s1] sm:$0xff]  ;;  %101 = vmatprep.subr.bf16.mxu0 %v136_v3  ;;  %105 = vmatprep.mubr.msk.bf16.mxu0 %vm137_vm0, %v136_v3 }
   0x2   :  { %v24_v4 = vpack.c.bf16 %v22_v1, %v21_v0  ;;  %v20_v5 = vld [vmem:[%s186_s1 + $0x8] sm:$0xff] }
   0x3   :  { %8 = vsyncpa [#allocation3], 0  ;;  %v23_v6 = vpack.c.bf16 %v20_v5, %v19_v2  ;;  %v16_v7 = vld [vmem:[%s185_s0] sm:$0xff]  ;;  %v17_v8 = vld [vmem:[%s185_s0 + $0x8] sm:$0xff]  ;;  %vm32_vm1 = vcmask 261120   ;;  %vm77_vm2 = vcmask 326656  }
   0x4   :  { %102 = vmatpush3.bf16.msra.mxu0 %v24_v4  ;;  %v18_v9 = vpack.c.bf16 %v17_v8, %v16_v7  ;;  %v96_v10 = vld [vmem:[%s187_s2] ss:$0 sm:$0xff]  ;;  %s138_s25 = smov [#allocation2]  }
   0x5   :  { %103 = vmatprep.subr.bf16.mxu0 %v136_v3  ;;  %s85_s26 = sshll.u32 %s138_s25, 4  ;;  %s86_s26 = int_to_ptr.vmem [resolvable:$true] %s85_s26 }
   0x6   :  { %s114_s0 = scalar_lea.vmem %s86_s26, 256  ;;  %p119_p1 = scmp.lt.s32.totalorder %s86_s26, %s86_s26 }
   0x7   :  { %p115_p0 = scmp.ne.s32.totalorder %s86_s26, %s114_s0  ;;  %p120_p2 = scmp.lt.s32.totalorder %s114_s0, %s114_s0 }
   0x8   :  { %104 = vmatpush3.bf16.msra.mxu0 %v23_v6 }
   0x9   :  { %p121_p3 = por %p120_p2, %p119_p1 }
   0xb   :  { %106 = vmatmul.mubr.msk.bf16.vlgmr.msra.gmra.mxu0 %vm32_vm1, %v18_v9  ;;  %p122_p4 = pnand %p121_p3, %p115_p0 }
  0xcb   :  { %v70_v11 = vpop.f32.mrf.mxu0 }
  0xcc   :  { %v71_v12 = vadd.f32 %v96_v10, %v70_v11 }
  0xcd   :  { %v107_v13 = vpop.f32.mrf.mxu0 }
  0xce   :  { %78 = vst.msk [vmem:[#allocation2] sm:$0xff] %vm77_vm2, %v71_v12 }
  0xcf   :  { %v73_v14 = vpop.f32.mrf.mxu0 }
  0xd0   :  { %v74_v15 = vadd.f32 %v96_v10, %v73_v14 }
  0xd1   :  { %v108_v16 = vpop.f32.mrf.mxu0 }
  0xd2   :  { %79 = vst.msk [vmem:[#allocation2 + $0x8] sm:$0xff] %vm77_vm2, %v74_v15 }
  0xd3   :  { %125 = shalt.err (!%p122_p4)
}
  0xd4   :  { %s139_s2 = smov 128   ;;  %s140_s27 = smov 8  }
  0xd5   :  { %91 = dma.vmem_to_hbm [thread:$0]  %s86_s26, 256, %s188_s3, [#allocation3], %s139_s2, %s139_s2, %s140_s27  }
  0xd6   :  { %134 = dma.done.wait [#allocation3], 256  }
  0xd7   :  { %135 = vsyncadd [#allocation3], 4294967040 }
  0xd8   :  { %95 = vsyncpa [#allocation3], 1 }

// kernel: _lambda_.12
= control target key start
LH: loop header
LB: loop body
LE: loop exit
PB: predicated region body
PF: predicated region fallthrough
CT: control target
= control target key end

     0   :  { %v248_v0 = vmov 0.0   ;;  %vm249_vm0 = vmmov 0   ;;  %vm43_vm1 = vcmask 261120   ;;  %vm110_vm2 = vcmask 523264   ;;  %s357_s1 = inlined_call_operand.vmem [shape: f32[32,64], index: 1, kind: input, shape index: {}]   ;;  %s358_s3 = inlined_call_operand.vmem [shape: f32[64,32], index: 3, kind: input, shape index: {}]   ;;  %s359_s0 = inlined_call_operand.vmem [shape: f32[16,32], index: 0, kind: input, shape index: {}]   ;;  %s360_s2 = inlined_call_operand.vmem [shape: f32[1,64], index: 2, kind: input, shape index: {}]   ;;  %s361_s4 = inlined_call_operand.vmem [shape: f32[1,32], index: 4, kind: input, shape index: {}, may-alias: {4,6}]   ;;  %s362_s5 = inlined_call_operand.vmem [shape: f32[1,32], index: 5, kind: input, shape index: {}]   ;;  %s363_s6 = inlined_call_operand.vmem [shape: f32[1,32], index: 6, kind: input, shape index: {}, may-alias: {4,6}]   ;;  %s364_s7 = inlined_call_operand.vmem [shape: f32[16,32], index: 7, kind: output, shape index: {}]  }
   0x1   :  { %222 = vmatprep.subr.bf16.mxu0 %v248_v0  ;;  %v32_v1 = vld [vmem:[%s357_s1 + $0x10] sm:$0xff]  ;;  %v33_v2 = vld [vmem:[%s357_s1 + $0x18] sm:$0xff]  ;;  %v30_v3 = vld [vmem:[%s357_s1] sm:$0xff]  ;;  %226 = vmatprep.mubr.msk.bf16.mxu0 %vm249_vm0, %v248_v0 }
   0x2   :  { %v35_v4 = vpack.c.bf16 %v33_v2, %v32_v1  ;;  %v31_v5 = vld [vmem:[%s357_s1 + $0x8] sm:$0xff]  ;;  %230 = vmatprep.subr.bf16.mxu1 %v248_v0  ;;  %238 = vmatprep.mubr.msk.bf16.mxu1 %vm249_vm0, %v248_v0  ;;  %v97_v6 = vld [vmem:[%s358_s3 + $0x30] sm:$0xff]  ;;  %v98_v7 = vld [vmem:[%s358_s3 + $0x38] sm:$0xff] }
   0x3   :  { %v34_v8 = vpack.c.bf16 %v31_v5, %v30_v3  ;;  %v27_v9 = vld [vmem:[%s359_s0] sm:$0xff]  ;;  %v28_v10 = vld [vmem:[%s359_s0 + $0x8] sm:$0xff]  ;;  %v102_v11 = vpack.c.bf16 %v98_v7, %v97_v6  ;;  %v93_v16 = vld [vmem:[%s358_s3 + $0x10] sm:$0xff] }
   0x4   :  { %223 = vmatpush3.bf16.msra.mxu0 %v35_v4  ;;  %v29_v12 = vpack.c.bf16 %v28_v10, %v27_v9  ;;  %v95_v13 = vld [vmem:[%s358_s3 + $0x20] sm:$0xff]  ;;  %v96_v14 = vld [vmem:[%s358_s3 + $0x28] sm:$0xff]  ;;  %v94_v17 = vld [vmem:[%s358_s3 + $0x18] sm:$0xff] }
   0x5   :  { %224 = vmatprep.subr.bf16.mxu0 %v248_v0  ;;  %231 = vmatpush3.bf16.msra.mxu1 %v102_v11  ;;  %v101_v15 = vpack.c.bf16 %v96_v14, %v95_v13  ;;  %v100_v18 = vpack.c.bf16 %v94_v17, %v93_v16  ;;  %v91_v19 = vld [vmem:[%s358_s3] sm:$0xff]  ;;  %v92_v20 = vld [vmem:[%s358_s3 + $0x8] sm:$0xff] }
   0x6   :  { %232 = vmatprep.subr.bf16.mxu1 %v248_v0  ;;  %v99_v21 = vpack.c.bf16 %v92_v20, %v91_v19  ;;  %v208_v22 = vld [vmem:[%s360_s2] ss:$0 sm:$0xff] }
   0x7   :  { %v210_v32 = vld [vmem:[%s361_s4] ss:$0 sm:$0xff] }
   0x8   :  { %225 = vmatpush3.bf16.msra.mxu0 %v34_v8  ;;  %v212_v60 = vld [vmem:[%s362_s5] ss:$0 sm:$0xff] }
   0x9   :  { %233 = vmatpush3.bf16.msra.mxu1 %v101_v15  ;;  %v213_v62 = vld [vmem:[%s363_s6] ss:$0 sm:$0xff] }
   0xa   :  { %234 = vmatprep.subr.bf16.mxu1 %v248_v0 }
   0xb   :  { %227 = vmatmul.mubr.msk.bf16.vlgmr.msra.gmra.mxu0 %vm43_vm1, %v29_v12 }
   0xd   :  { %235 = vmatpush3.bf16.msra.mxu1 %v100_v18 }
   0xe   :  { %236 = vmatprep.subr.bf16.mxu1 %v248_v0 }
  0x11   :  { %237 = vmatpush3.bf16.msra.mxu1 %v99_v21 }
  0xcb   :  { %v81_v23 = vpop.f32.mrf.mxu0 }
  0xcc   :  { %v82_v25 = vadd.f32 %v208_v22, %v81_v23 }
  0xcd   :  { %v228_v24 = vpop.f32.mrf.mxu0 }
  0xce   :  { %v88_v29 = vmax.f32 %v82_v25, 0.0 }
  0xcf   :  { %v84_v26 = vpop.f32.mrf.mxu0 }
  0xd0   :  { %v85_v27 = vadd.f32 %v208_v22, %v84_v26 }
  0xd1   :  { %v229_v28 = vpop.f32.mrf.mxu0 }
  0xd2   :  { %v89_v30 = vmax.f32 %v85_v27, 0.0 }
  0xd4   :  { %v90_v31 = vpack.c.bf16 %v89_v30, %v88_v29 }
  0xd6   :  { %239 = vmatmul.mubr.msk.bf16.vlgmr.msra.gmra.mxu1 %vm110_vm2, %v90_v31 }
 0x196   :  { %v148_v33 = vpop.f32.mrf.mxu1 }
 0x197   :  { %v149_v34 = vadd.f32 %v210_v32, %v148_v33 }
 0x198   :  { %v240_v35 = vpop.f32.mrf.mxu1 }
 0x199   :  { %v155_v36 = vadd.f32 %v149_v34, %v27_v9 }
 0x19a   :  { %v151_v37 = vpop.f32.mrf.mxu1 }
 0x19b   :  { %v152_v38 = vadd.f32 %v210_v32, %v151_v37  ;;  %v157_v39 = vsel %vm43_vm1, %v155_v36, 0.0 }
 0x19c   :  { %158 = vadd.xlane.f32.xlu0 %v157_v39  ;;  %v241_v40 = vpop.f32.mrf.mxu1 }
 0x19d   :  { %v156_v41 = vadd.f32 %v152_v38, %v28_v10 }
 0x19f   :  { %v160_v42 = vsel %vm43_vm1, %v156_v41, 0.0 }
 0x1a0   :  { %161 = vadd.xlane.f32.xlu0 %v160_v42 }
 0x225   :  { %v159_v43 = vpop.xlane.xlu0 %158 }
 0x226   :  { %v164_v44 = vmul.f32 0.03125, %v159_v43 }
 0x228   :  { %v166_v45 = vsub.f32 %v155_v36, %v164_v44 }
 0x229   :  { %v162_v46 = vpop.xlane.xlu0 %161 }
 0x22a   :  { %v165_v47 = vmul.f32 0.03125, %v162_v46  ;;  %v168_v48 = vmul.f32 %v166_v45, %v166_v45 }
 0x22c   :  { %v167_v49 = vsub.f32 %v156_v41, %v165_v47  ;;  %v170_v50 = vsel %vm43_vm1, %v168_v48, 0.0 }
 0x22d   :  { %171 = vadd.xlane.f32.xlu1 %v170_v50 }
 0x22e   :  { %v169_v51 = vmul.f32 %v167_v49, %v167_v49 }
 0x230   :  { %v173_v52 = vsel %vm43_vm1, %v169_v51, 0.0 }
 0x231   :  { %174 = vadd.xlane.f32.xlu1 %v173_v52 }
 0x2b6   :  { %v172_v53 = vpop.xlane.xlu1 %171 }
 0x2b7   :  { %v176_v54 = vmul.f32 0.03125, %v172_v53 }
 0x2b9   :  { %v178_v55 = vadd.f32 1e-05, %v176_v54 }
 0x2ba   :  { %v175_v56 = vpop.xlane.xlu1 %174 }
 0x2bb   :  { %244 = vrsqrt.f32 %v178_v55  ;;  %v177_v57 = vmul.f32 0.03125, %v175_v56 }
 0x2bd   :  { %v179_v58 = vadd.f32 1e-05, %v177_v57 }
 0x2bf   :  { %246 = vrsqrt.f32 %v179_v58 }
 0x2c8   :  { %v245_v59 = vpop.eup %244 }
 0x2c9   :  { %v182_v61 = vmul.f32 %v245_v59, %v166_v45 }
 0x2cb   :  { %v191_v63 = vmul.f32 %v212_v60, %v182_v61 }
 0x2cc   :  { %v247_v0 = vpop.eup %246 }
 0x2cd   :  { %v200_v1 = vadd.f32 %v213_v62, %v191_v63  ;;  %v183_v2 = vmul.f32 %v247_v0, %v167_v49 }
 0x2cf   :  { %202 = vst.msk [vmem:[%s364_s7] sm:$0xff] %vm43_vm1, %v200_v1  ;;  %v192_v3 = vmul.f32 %v212_v60, %v183_v2 }
 0x2d1   :  { %v201_v4 = vadd.f32 %v213_v62, %v192_v3 }
 0x2d3   :  { %203 = vst.msk [vmem:[%s364_s7 + $0x8] sm:$0xff] %vm43_vm1, %v201_v4 }

// kernel: _lambda_.11
= control target key start
LH: loop header
LB: loop body
LE: loop exit
PB: predicated region body
PF: predicated region fallthrough
CT: control target
= control target key end

     0   :  { %s1403_s17 = smov 0   ;;  %s1571_s0 = inlined_call_operand.vmem [shape: f32[2,8,32], index: 0, kind: input, shape index: {}, may-alias: {0,1}]   ;;  %s1572_s1 = inlined_call_operand.vmem [shape: f32[2,8,32], index: 1, kind: input, shape index: {}, may-alias: {0,1}]   ;;  %s1573_s2 = inlined_call_operand.vmem [shape: f32[2,8,8], index: 2, kind: input, shape index: {}]   ;;  %s1574_s3 = inlined_call_operand.vmem [shape: f32[32,32], index: 3, kind: input, shape index: {}]   ;;  %s1575_s4 = inlined_call_operand.vmem [shape: f32[1,32], index: 4, kind: input, shape index: {}, may-alias: {4,8,10}]   ;;  %s1576_s5 = inlined_call_operand.vmem [shape: f32[32,64], index: 5, kind: input, shape index: {}]   ;;  %s1577_s6 = inlined_call_operand.vmem [shape: f32[1,64], index: 6, kind: input, shape index: {}]   ;;  %s1578_s7 = inlined_call_operand.vmem [shape: f32[32,32], index: 7, kind: input, shape index: {}]   ;;  %s1579_s8 = inlined_call_operand.vmem [shape: f32[1,32], index: 8, kind: input, shape index: {}, may-alias: {4,8,10}]   ;;  %s1580_s9 = inlined_call_operand.vmem [shape: f32[1,32], index: 9, kind: input, shape index: {}]   ;;  %s1581_s10 = inlined_call_operand.vmem [shape: f32[1,32], index: 10, kind: input, shape index: {}, may-alias: {4,8,10}]   ;;  %s1582_s11 = inlined_call_operand.vmem [shape: f32[2,8,32], index: 11, kind: output, shape index: {}]  }
   0x1 LB: > { %s1161_s18 = sadd.s32 4294967295, %s1329_s17   ;;  %p1165_p0 = scmp.ge.s32.totalorder %s1329_s17, 1  ;;  %s1329_s17 = sphi %s1403_s17, %s21_s17  }
   0x2   : > { %p354_p1 = scmp.lt.s32.totalorder %s1329_s17, 3 }
   0x4   : > { %p355_p2 = pnand %p1165_p0, %p354_p1 }
   0x5   : > { %p1420_p3 = scmp.lt.s32.totalorder (!%p355_p2), %s1161_s18, 1  ;;  %s1333_s29 = smov (!%p355_p2), 112  }
   0x6   : > { %358 = sbr.rel (%p355_p2) target bundleno = 1690 (0x69a), region = 64  ;;  %s1334_s30 = smov (!%p355_p2), 120  }
   0x7   : > { %s1335_s12 = smov (!%p355_p2), 104   ;;  %s1336_s16 = smov (!%p355_p2), 96  }
   0x8   : > { %s1337_s20 = smov (!%p355_p2), 80   ;;  %s1338_s21 = smov (!%p355_p2), 72  }
   0x9   : > { %s1340_s26 = smov (!%p355_p2), 8   ;;  %s1342_s13 = smov (!%p355_p2), 24  }
   0xb   : > { %v424_v0 = vld [vmem:[%s1574_s3 + $0x10] sm:$0xff]  ;;  %v425_v1 = vld [vmem:[%s1574_s3 + $0x18] sm:$0xff]  ;;  %v1331_v3 = vmov 0.0   ;;  %v422_v6 = vld [vmem:[%s1574_s3] sm:$0xff]  ;;  %vm1332_vm0 = vmmov 0   ;;  %s1585_s18 = smov (!%p1420_p3, %s1161_s18), 1 }
   0xc   : > { %v482_v2 = vld [vmem:[%s1576_s5 + $0x10] sm:$0xff]  ;;  %1213 = vmatprep.subr.bf16.mxu0 %v1331_v3  ;;  %1221 = vmatprep.subr.bf16.mxu1 %v1331_v3  ;;  %v427_v4 = vpack.c.bf16 %v425_v1, %v424_v0  ;;  %v483_v5 = vld [vmem:[%s1576_s5 + $0x18] sm:$0xff]  ;;  %v423_v7 = vld [vmem:[%s1574_s3 + $0x8] sm:$0xff]  ;;  %s1448_s19 = sshll.u32 %s1585_s18, 3  ;;  %vm435_vm1 = vcmask 261120   ;;  %vm538_vm2 = vcmask 64512  }
   0xd   : > { %v485_v8 = vpack.c.bf16 %v483_v5, %v482_v2  ;;  %v480_v9 = vld [vmem:[%s1576_s5] sm:$0xff]  ;;  %v481_v10 = vld [vmem:[%s1576_s5 + $0x8] sm:$0xff]  ;;  %1217 = vmatprep.mubr.msk.bf16.mxu0 %vm1332_vm0, %v1331_v3  ;;  %1225 = vmatprep.mubr.msk.bf16.mxu1 %vm1332_vm0, %v1331_v3  ;;  %v426_v11 = vpack.c.bf16 %v423_v7, %v422_v6  ;;  %s403_s22 = scalar_lea.vmem %s1571_s0, %s1448_s19  ;;  %s407_s25 = scalar_lea.vmem %s1572_s1, %s1448_s19  ;;  %vm603_vm3 = vcmask 1043456   ;;  %vm991_vm4 = vcmask 130048  }
   0xe   : > { %1214 = vmatpush3.bf16.msra.mxu0 %v427_v4  ;;  %v484_v12 = vpack.c.bf16 %v481_v10, %v480_v9  ;;  %v1455_v13 = vld [vmem:[%s403_s22] sm:$0xff]  ;;  %s411_s15 = scalar_lea.vmem %s1573_s2, %s1448_s19  ;;  %s1339_s22 = smov 88   ;;  %vm993_vm5 = vcmask 195584  }
   0xf   : > { %1222 = vmatpush3.bf16.msra.mxu1 %v485_v8  ;;  %1215 = vmatprep.subr.bf16.mxu0 %v1331_v3  ;;  %v420_v14 = vpack.c.bf16 %v1455_v13, %v1455_v13  ;;  %v418_v15 = vld [vmem:[%s407_s25] sm:$0xff]  ;;  %s415_s25 = scalar_lea.vmem %s1582_s11, %s1448_s19 }
  0x10   : > { %1223 = vmatprep.subr.bf16.mxu1 %v1331_v3  ;;  %v421_v16 = vpack.c.bf16 %v418_v15, %v418_v15  ;;  %v1170_v17 = vld [vmem:[%s1575_s4] ss:$0 sm:$0xff] }
  0x11   : > { %v1172_v18 = vld [vmem:[%s1577_s6] ss:$0 sm:$0xff] }
  0x12   : > { %1216 = vmatpush3.bf16.msra.mxu0 %v426_v11  ;;  %v419_v42 = vld [vmem:[%s411_s15] sm:$0xff] }
  0x13   : > { %1224 = vmatpush3.bf16.msra.mxu1 %v484_v12  ;;  %1229 = vmatprep.subr.bf16.mxu0 %v1331_v3 }
  0x14   : > { %1235 = vmatprep.subr.bf16.mxu1 %v1331_v3 }
  0x15   : > { %1218 = vmatmul.mubr.msk.bf16.vlgmr.msra.gmra.mxu0 %vm435_vm1, %v420_v14 }
  0x16   : > { %1226 = vmatmul.mubr.msk.bf16.vlgmr.msra.gmra.mxu1 %vm435_vm1, %v421_v16  ;;  %1231 = vmatprep.mubr.msk.bf16.mxu0 %vm1332_vm0, %v1331_v3 }
  0x17   : > { %1237 = vmatprep.mubr.msk.bf16.mxu1 %vm1332_vm0, %v1331_v3 }
  0xd5   : > { %v473_v19 = vpop.f32.mrf.mxu0 }
  0xd6   : > { %v474_v20 = vadd.f32 %v1170_v17, %v473_v19  ;;  %v530_v21 = vpop.f32.mrf.mxu1 }
  0xd7   : > { %v531_v22 = vadd.f32 %v1172_v18, %v530_v21  ;;  %v1219_v23 = vpop.f32.mrf.mxu0 }
  0xd8   : > { %v479_v24 = vmul.f32 0.35355338, %v474_v20  ;;  %v1227_v25 = vpop.f32.mrf.mxu1 }
  0xd9   : > { %v1477_v26 = vpack.c.bf16 %v531_v22, %v531_v22  ;;  %v476_v27 = vpop.f32.mrf.mxu0 }
  0xda   : > { %v533_v28 = vpop.f32.mrf.mxu1  ;;  %v536_v29 = vpack.c.bf16 %v479_v24, %v479_v24 }
  0xdb   : > { %760 = vrot.lane.b32.xlu1 %v1477_v26, %s1333_s29  ;;  %650 = vrot.lane.b32.xlu0 %v1477_v26, %s1334_s30  ;;  %v1220_v30 = vpop.f32.mrf.mxu0  ;;  %v543_v31 = vsel %vm538_vm2, %v1477_v26, 0 }
  0xdc   : > { %v1228_v32 = vpop.f32.mrf.mxu1  ;;  %1230 = vmatpush3.bf16.xpose.msra.mxu0 %v543_v31 }
  0xdd   : > { %1241 = vmatprep.subr.bf16.mxu0 %v1331_v3 }
  0xdf   : > { %758 = vrot.lane.b32.xlu1 %v536_v29, %s1333_s29  ;;  %648 = vrot.lane.b32.xlu0 %v536_v29, %s1334_s30 }
  0xe3   : > { %868 = vrot.lane.b32.xlu1 %v536_v29, %s1335_s12  ;;  %870 = vrot.lane.b32.xlu0 %v1477_v26, %s1335_s12  ;;  %s1341_s12 = smov 16  }
  0xe4   : > { %1232 = vmatmul.mubr.msk.bf16.vlgmr.msra.gmra.mxu0 %vm538_vm2, %v536_v29 }
  0xe5   : > { %1243 = vmatprep.mubr.msk.bf16.mxu0 %vm1332_vm0, %v1331_v3 }
 0x14d   : > { %v651_v33 = vpop.permute.xlu0 %650  ;;  %v761_v35 = vpop.permute.xlu1 %760 }
 0x14e   : > { %v656_v34 = vsel %vm538_vm2, %v651_v33, 0  ;;  %v766_v37 = vsel %vm538_vm2, %v761_v35, 0 }
 0x14f   : > { %1242 = vmatpush3.bf16.xpose.msra.mxu0 %v656_v34 }
 0x150   : > { %1253 = vmatprep.subr.bf16.mxu0 %v1331_v3 }
 0x151   : > { %v649_v36 = vpop.permute.xlu0 %648  ;;  %v759_v39 = vpop.permute.xlu1 %758 }
 0x155   : > { %v871_v38 = vpop.permute.xlu0 %870  ;;  %v869_v41 = vpop.permute.xlu1 %868 }
 0x156   : > { %1244 = vmatmul.mubr.msk.bf16.vlgmr.msra.gmra.mxu0 %vm538_vm2, %v649_v36  ;;  %v876_v40 = vsel %vm538_vm2, %v871_v38, 0 }
 0x157   : > { %1254 = vmatpush3.bf16.xpose.msra.mxu0 %v766_v37  ;;  %1255 = vmatprep.mubr.msk.bf16.mxu0 %vm1332_vm0, %v1331_v3 }
 0x158   : > { %1265 = vmatprep.subr.bf16.mxu0 %v1331_v3 }
 0x15e   : > { %1256 = vmatmul.mubr.msk.bf16.vlgmr.msra.gmra.mxu0 %vm538_vm2, %v759_v39 }
 0x15f   : > { %1266 = vmatpush3.bf16.xpose.msra.mxu0 %v876_v40  ;;  %1267 = vmatprep.mubr.msk.bf16.mxu0 %vm1332_vm0, %v1331_v3 }
 0x160   : > { %1277 = vmatprep.subr.bf16.mxu0 %v1331_v3 }
 0x166   : > { %1268 = vmatmul.mubr.msk.bf16.vlgmr.msra.gmra.mxu0 %vm538_vm2, %v869_v41 }
 0x167   : > { %1281 = vmatprep.mubr.msk.bf16.mxu0 %vm1332_vm0, %v1331_v3 }
 0x1a4   : > { %v579_v43 = vpop.f32.mrf.mxu0 }
 0x1a5   : > { %v580_v44 = vadd.f32 %v579_v43, %v419_v42 }
 0x1a6   : > { %v1233_v45 = vpop.f32.mrf.mxu0 }
 0x1a7   : > { %v585_v46 = vsel %vm538_vm2, %v580_v44, -inf }
 0x1a8   : > { %586 = vmax.xlane.f32.xlu0 %v585_v46  ;;  %v582_v47 = vpop.f32.mrf.mxu0 }
 0x1aa   : > { %v1234_v48 = vpop.f32.mrf.mxu0 }
 0x216   : > { %v692_v49 = vpop.f32.mrf.mxu0 }
 0x217   : > { %v693_v50 = vadd.f32 %v692_v49, %v419_v42 }
 0x218   : > { %v1245_v51 = vpop.f32.mrf.mxu0 }
 0x219   : > { %v698_v52 = vsel %vm538_vm2, %v693_v50, -inf }
 0x21a   : > { %699 = vmax.xlane.f32.xlu1 %v698_v52  ;;  %v695_v53 = vpop.f32.mrf.mxu0 }
 0x21b   : > { %v998_v53 = vld [vmem:[%s1578_s7 + $0x10] sm:$0xff] }
 0x21c   : > { %v1246_v54 = vpop.f32.mrf.mxu0 }
 0x21d   : > { %v999_v54 = vld [vmem:[%s1578_s7 + $0x18] sm:$0xff] }
 0x21e   : > { %v802_v55 = vpop.f32.mrf.mxu0 }
 0x21f   : > { %v803_v56 = vadd.f32 %v802_v55, %v419_v42  ;;  %v1001_v55 = vpack.c.bf16 %v999_v54, %v998_v53 }
 0x220   : > { %v1257_v57 = vpop.f32.mrf.mxu0 }
 0x221   : > { %v808_v58 = vsel %vm538_vm2, %v803_v56, -inf  ;;  %1278 = vmatpush3.bf16.msra.mxu0 %v1001_v55 }
 0x222   : > { %809 = vmax.xlane.f32.xlu0 %v808_v58  ;;  %v805_v59 = vpop.f32.mrf.mxu0  ;;  %1279 = vmatprep.subr.bf16.mxu0 %v1331_v3  ;;  %v996_v58 = vld [vmem:[%s1578_s7] sm:$0xff] }
 0x223   : > { %v997_v59 = vld [vmem:[%s1578_s7 + $0x8] sm:$0xff] }
 0x224   : > { %v1258_v60 = vpop.f32.mrf.mxu0 }
 0x225   : > { %v1000_v60 = vpack.c.bf16 %v997_v59, %v996_v58 }
 0x226   : > { %v912_v61 = vpop.f32.mrf.mxu0 }
 0x227   : > { %v913_v62 = vadd.f32 %v912_v61, %v419_v42  ;;  %1280 = vmatpush3.bf16.msra.mxu0 %v1000_v60 }
 0x228   : > { %v1269_v63 = vpop.f32.mrf.mxu0 }
 0x229   : > { %v918_v0 = vsel %vm538_vm2, %v913_v62, -inf }
 0x22a   : > { %919 = vmax.xlane.f32.xlu0 %v918_v0  ;;  %v915_v1 = vpop.f32.mrf.mxu0 }
 0x22c   : > { %v1270_v2 = vpop.f32.mrf.mxu0 }
 0x231   : > { %v587_v4 = vpop.xlane.xlu0 %586 }
 0x232   : > { %v588_v5 = vsub.f32 %v580_v44, %v587_v4 }
 0x234   : > { %v589_v6 = vmul.f32 1.442695, %v588_v5 }
 0x236   : > { %1305 = vpow2.f32 %v589_v6 }
 0x243   : > { %v1306_v7 = vpop.eup %1305 }
 0x244   : > { %v591_v8 = vsel %vm538_vm2, %v1306_v7, 0.0 }
 0x245   : > { %592 = vadd.xlane.f32.xlu1 %v591_v8 }
 0x256   : > { %598 = vrot.lane.b32.xlu1 %v1477_v26, %s1336_s16 }
 0x2a3   : > { %v700_v9 = vpop.xlane.xlu1 %699 }
 0x2a4   : > { %v701_v10 = vsub.f32 %v693_v50, %v700_v9 }
 0x2a6   : > { %v702_v11 = vmul.f32 1.442695, %v701_v10 }
 0x2a8   : > { %1307 = vpow2.f32 %v702_v11 }
 0x2ab   : > { %v810_v12 = vpop.xlane.xlu0 %809 }
 0x2ac   : > { %v811_v14 = vsub.f32 %v803_v56, %v810_v12 }
 0x2ae   : > { %v812_v15 = vmul.f32 1.442695, %v811_v14 }
 0x2b0   : > { %1309 = vpow2.f32 %v812_v15  ;;  %v1182_v15 = vld [vmem:[%s1579_s8] ss:$0 sm:$0xff] }
 0x2b3   : > { %v920_v16 = vpop.xlane.xlu0 %919 }
 0x2b4   : > { %v921_v17 = vsub.f32 %v913_v62, %v920_v16 }
 0x2b5   : > { %v1308_v18 = vpop.eup %1307 }
 0x2b6   : > { %v922_v19 = vmul.f32 1.442695, %v921_v17  ;;  %v704_v20 = vsel %vm538_vm2, %v1308_v18, 0.0 }
 0x2b7   : > { %705 = vadd.xlane.f32.xlu0 %v704_v20 }
 0x2b8   : > { %1311 = vpow2.f32 %v922_v19 }
 0x2bd   : > { %v1310_v21 = vpop.eup %1309 }
 0x2be   : > { %v814_v22 = vsel %vm538_vm2, %v1310_v21, 0.0 }
 0x2bf   : > { %815 = vadd.xlane.f32.xlu1 %v814_v22 }
 0x2c5   : > { %v1312_v23 = vpop.eup %1311 }
 0x2c6   : > { %v924_v24 = vsel %vm538_vm2, %v1312_v23, 0.0 }
 0x2c7   : > { %925 = vadd.xlane.f32.xlu0 %v924_v24 }
 0x2ce   : > { %v593_v25 = vpop.xlane.xlu1 %592 }
 0x2cf   : > { %1313 = vrcp.f32 %v593_v25 }
 0x2d0   : > { %820 = vrot.lane.b32.xlu1 %v1477_v26, %s1337_s20 }
 0x2d2   : > { %v599_v27 = vpop.permute.xlu1 %598 }
 0x2d3   : > { %v605_v28 = vsel %vm603_vm3, %v599_v27, 0 }
 0x2d4   : > { %1236 = vmatpush3.bf16.msra.mxu1 %v605_v28  ;;  %930 = vrot.lane.b32.xlu1 %v1477_v26, %s1338_s21 }
 0x2d5   : > { %1247 = vmatprep.subr.bf16.mxu1 %v1331_v3 }
 0x2dc   : > { %v1314_v29 = vpop.eup %1313 }
 0x2dd   : > { %710 = vrot.lane.b32.xlu0 %v1477_v26, %s1339_s22  ;;  %v595_v30 = vmul.f32 %v1314_v29, %v1306_v7 }
 0x2df   : > { %v596_v31 = vpack.c.bf16 %v595_v30, %v595_v30 }
 0x2e1   : > { %1238 = vmatmul.mubr.msk.bf16.vlgmr.msra.gmra.mxu1 %vm538_vm2, %v596_v31 }
 0x2e2   : > { %1249 = vmatprep.mubr.msk.bf16.mxu1 %vm1332_vm0, %v1331_v3 }
 0x340   : > { %v706_v32 = vpop.xlane.xlu0 %705 }
 0x341   : > { %1315 = vrcp.f32 %v706_v32 }
 0x348   : > { %v816_v33 = vpop.xlane.xlu1 %815 }
 0x349   : > { %1317 = vrcp.f32 %v816_v33 }
 0x34c   : > { %v821_v39 = vpop.permute.xlu1 %820 }
 0x34d   : > { %v826_v41 = vsel %vm603_vm3, %v821_v39, 0 }
 0x34e   : > { %v1316_v34 = vpop.eup %1315 }
 0x34f   : > { %v708_v36 = vmul.f32 %v1316_v34, %v1308_v18  ;;  %v1185_v34 = vld [vmem:[%s1581_s10] ss:$0 sm:$0xff] }
 0x350   : > { %v926_v35 = vpop.xlane.xlu0 %925  ;;  %v931_v43 = vpop.permute.xlu1 %930 }
 0x351   : > { %1319 = vrcp.f32 %v926_v35  ;;  %v709_v26 = vpack.c.bf16 %v708_v36, %v708_v36  ;;  %v936_v46 = vsel %vm603_vm3, %v931_v43, 0 }
 0x354   : > { %v711_v37 = vpop.permute.xlu0 %710 }
 0x355   : > { %v716_v38 = vsel %vm603_vm3, %v711_v37, 0 }
 0x356   : > { %1248 = vmatpush3.bf16.msra.mxu1 %v716_v38  ;;  %v1318_v40 = vpop.eup %1317 }
 0x357   : > { %1259 = vmatprep.subr.bf16.mxu1 %v1331_v3  ;;  %v818_v42 = vmul.f32 %v1318_v40, %v1310_v21 }
 0x359   : > { %1250 = vmatmul.mubr.msk.bf16.vlgmr.msra.gmra.mxu1 %vm538_vm2, %v709_v26  ;;  %v819_v44 = vpack.c.bf16 %v818_v42, %v818_v42 }
 0x35a   : > { %1260 = vmatpush3.bf16.msra.mxu1 %v826_v41  ;;  %1261 = vmatprep.mubr.msk.bf16.mxu1 %vm1332_vm0, %v1331_v3 }
 0x35b   : > { %1271 = vmatprep.subr.bf16.mxu1 %v1331_v3 }
 0x35e   : > { %v1320_v45 = vpop.eup %1319 }
 0x35f   : > { %v928_v47 = vmul.f32 %v1320_v45, %v1312_v23 }
 0x361   : > { %1262 = vmatmul.mubr.msk.bf16.vlgmr.msra.gmra.mxu1 %vm538_vm2, %v819_v44  ;;  %v929_v48 = vpack.c.bf16 %v928_v47, %v928_v47 }
 0x362   : > { %1272 = vmatpush3.bf16.msra.mxu1 %v936_v46  ;;  %1273 = vmatprep.mubr.msk.bf16.mxu1 %vm1332_vm0, %v1331_v3 }
 0x369   : > { %1274 = vmatmul.mubr.msk.bf16.vlgmr.msra.gmra.mxu1 %vm538_vm2, %v929_v48 }
 0x3a1   : > { %v641_v49 = vpop.f32.mrf.mxu1 }
 0x3a3   : > { %v1239_v50 = vpop.f32.mrf.mxu1 }
 0x3a5   : > { %v644_v51 = vpop.f32.mrf.mxu1 }
 0x3a7   : > { %v1240_v52 = vpop.f32.mrf.mxu1 }
 0x419   : > { %v752_v56 = vpop.f32.mrf.mxu1 }
 0x41a   : > { %979 = vrot.lane.b32.xlu0 %v752_v56, %s1340_s26 }
 0x41b   : > { %v1251_v57 = vpop.f32.mrf.mxu1 }
 0x41d   : > { %v755_v61 = vpop.f32.mrf.mxu1 }
 0x41f   : > { %v1252_v62 = vpop.f32.mrf.mxu1 }
 0x421   : > { %v862_v63 = vpop.f32.mrf.mxu1 }
 0x422   : > { %983 = vrot.lane.b32.xlu1 %v862_v63, %s1341_s12 }
 0x423   : > { %v1263_v0 = vpop.f32.mrf.mxu1 }
 0x425   : > { %v865_v3 = vpop.f32.mrf.mxu1 }
 0x427   : > { %v1264_v1 = vpop.f32.mrf.mxu1 }
 0x429   : > { %v972_v2 = vpop.f32.mrf.mxu1 }
 0x42a   : > { %987 = vrot.lane.b32.xlu0 %v972_v2, %s1342_s13 }
 0x42b   : > { %v1275_v4 = vpop.f32.mrf.mxu1 }
 0x42d   : > { %v975_v5 = vpop.f32.mrf.mxu1 }
 0x42f   : > { %v1276_v6 = vpop.f32.mrf.mxu1 }
 0x48c   : > { %v980_v7 = vpop.permute.xlu0 %979 }
 0x48d   : > { %v990_v9 = vsel %vm538_vm2, %v641_v49, %v980_v7 }
 0x494   : > { %v984_v8 = vpop.permute.xlu1 %983 }
 0x495   : > { %v992_v10 = vsel %vm991_vm4, %v990_v9, %v984_v8 }
 0x49c   : > { %v988_v11 = vpop.permute.xlu0 %987 }
 0x49d   : > { %v994_v12 = vsel %vm993_vm5, %v992_v10, %v988_v11 }
 0x49e   : > { %v995_v14 = vpack.c.bf16 %v994_v12, %v994_v12 }
 0x4a0   : > { %1282 = vmatmul.mubr.msk.bf16.vlgmr.msra.gmra.mxu0 %vm435_vm1, %v995_v14 }
 0x560   : > { %v1046_v16 = vpop.f32.mrf.mxu0 }
 0x561   : > { %v1047_v17 = vadd.f32 %v1182_v15, %v1046_v16 }
 0x562   : > { %v1283_v18 = vpop.f32.mrf.mxu0 }
 0x563   : > { %v1052_v19 = vadd.f32 %v1047_v17, %v1455_v13  ;;  %v1184_v13 = vld [vmem:[%s1580_s9] ss:$0 sm:$0xff] }
 0x564   : > { %v1049_v20 = vpop.f32.mrf.mxu0 }
 0x565   : > { %v1053_v21 = vsel %vm435_vm1, %v1052_v19, 0.0 }
 0x566   : > { %1054 = vadd.xlane.f32.xlu1 %v1053_v21  ;;  %v1284_v22 = vpop.f32.mrf.mxu0 }
 0x5ef   : > { %v1055_v23 = vpop.xlane.xlu1 %1054 }
 0x5f0   : > { %v1057_v24 = vmul.f32 0.03125, %v1055_v23 }
 0x5f2   : > { %v1058_v25 = vsub.f32 %v1052_v19, %v1057_v24 }
 0x5f4   : > { %v1059_v27 = vmul.f32 %v1058_v25, %v1058_v25 }
 0x5f6   : > { %v1060_v28 = vsel %vm435_vm1, %v1059_v27, 0.0 }
 0x5f7   : > { %1061 = vadd.xlane.f32.xlu0 %v1060_v28 }
 0x680   : > { %v1062_v29 = vpop.xlane.xlu0 %1061 }
 0x681   : > { %v1063_v30 = vmul.f32 0.03125, %v1062_v29 }
 0x683   : > { %v1064_v31 = vadd.f32 1e-05, %v1063_v30 }
 0x685   : > { %1321 = vrsqrt.f32 %v1064_v31 }
 0x692   : > { %v1322_v32 = vpop.eup %1321 }
 0x693   : > { %v1066_v33 = vmul.f32 %v1322_v32, %v1058_v25 }
 0x695   : > { %v1074_v35 = vmul.f32 %v1184_v13, %v1066_v33 }
 0x697   : > { %v1082_v36 = vadd.f32 %v1185_v34, %v1074_v35 }
 0x699   : > { %1083 = vst.msk [vmem:[%s415_s25] sm:$0xff] %vm435_vm1, %v1082_v36 }
 0x69a PF: > { %s21_s17 = sadd.s32 1, %s1329_s17  }
 0x69b   : > { %p18_p4 = scmp.ge.s32.totalorder %s21_s17, 4  }
 0x69d   :  { %20 = sbr.rel (!%p18_p4) target bundleno = 1 (0x1), region = 100 }

</bundles_post_ra>
